<compile_context>
chip_gen: v7x
topology: tpu7x:2x2x1
jax: 0.10.0
libtpu: 0.0.40
codegen_flags: <defaults>
</compile_context>

<pallas_src>
import numpy as np
from functools import partial

import jax
import jax.numpy as jnp
from jax.experimental import pallas as pl
from jax.experimental.pallas import tpu as pltpu  # noqa: F401


# ----------------------------- fused Pallas kernel -----------------------------

def _fused_decoder_kernel(num_ln_layers, eps, *refs):
    """refs = (z, fc_wT, fc_b, [M_i, bias_i, gamma_i, beta_i] * num_ln_layers,
               M_final, bias_final, out).

    All layer matrices M already encode ConvTranspose2d (kernel scatter) +
    ReplicationPad2d, with (c, h, w) row-major flattening on both sides, so a
    layer is one matmul + row-wise LayerNorm + activation.  Everything stays
    VMEM/vreg resident; only `out` (lane-dense, B x C*H*W) is written back.
    """
    out_ref = refs[-1]
    z_ref, fcw_ref, fcb_ref = refs[0], refs[1], refs[2]
    idx = 3

    # fc: tiny (B, latent) x (latent, C*H0*W0); f32 operands, f32 accumulation.
    x = (jnp.dot(z_ref[...], fcw_ref[...], preferred_element_type=jnp.float32)
         + fcb_ref[...])                                    # (B, C*H0*W0)

    for _ in range(num_ln_layers):
        m_ref, b_ref, g_ref, be_ref = refs[idx:idx + 4]
        idx += 4
        m = m_ref[...]                                      # (in_dim, out_dim) bf16
        # One matmul for the whole batch (batch loop collapsed), f32 accum.
        y = (jnp.dot(x.astype(m.dtype), m,
                     preferred_element_type=jnp.float32) + b_ref[...])

        # LayerNorm over (C, H, W) == the full lane axis of each sample row.
        # NOTE: the replication-padded (duplicated) edge pixels are included in
        # the statistics, matching nn.Sequential(ConvT, RepPad, LayerNorm).
        mean = jnp.mean(y, axis=1, keepdims=True)
        d = y - mean
        var = jnp.mean(d * d, axis=1, keepdims=True)
        y = d * jax.lax.rsqrt(var + eps)
        y = y * g_ref[...] + be_ref[...]
        x = jnp.maximum(y, 0.0)                             # ReLU

    mf_ref, bf_ref = refs[idx], refs[idx + 1]
    mf = mf_ref[...]
    y = (jnp.dot(x.astype(mf.dtype), mf,
                 preferred_element_type=jnp.float32) + bf_ref[...])
    out_ref[...] = jax.nn.sigmoid(y)                        # (B, C*H*W) f32


def make_decoder_forward(num_ln_layers, out_dim, eps=1e-5):
    kernel = partial(_fused_decoder_kernel, num_ln_layers, eps)

    @jax.jit
    def fwd(z, *flat_params):
        B = z.shape[0]
        return pl.pallas_call(
            kernel,
            out_shape=jax.ShapeDtypeStruct((B, out_dim), jnp.float32),
        )(z, *flat_params)

    return fwd


# ----------------------- host-side (one-time) param prep -----------------------

def build_convT_pad_matrix(w_torch, H, W, stride, next_h, next_w):
    """Dense matrix of ConvTranspose2d(stride) followed by ReplicationPad2d
    (right/bottom) as a linear map  x_flat(Cin*H*W) -> y_flat(Cout*next_h*next_w),
    both flattened (c, h, w) row-major."""
    w = np.asarray(w_torch, np.float32)          # (Cin, Cout, K, K)
    Cin, Cout, K, _ = w.shape
    Hc, Wc = (H - 1) * stride + K, (W - 1) * stride + K
    M = np.zeros((Cin, H, W, Cout, Hc, Wc), np.float32)
    for ih in range(H):
        for iw in range(W):
            M[:, ih, iw, :, ih * stride:ih * stride + K,
              iw * stride:iw * stride + K] += w
    ph, pw = next_h - Hc, next_w - Wc
    if ph > 0 or pw > 0:
        M = np.pad(M, ((0, 0),) * 4 + ((0, ph), (0, pw)), mode="edge")
    return M.reshape(Cin * H * W, Cout * next_h * next_w)


def prepare_params(params, cfg, matmul_dtype=jnp.bfloat16):
    """One-time conversion of PyTorch-layout params into the flat tuple of
    kernel inputs.  Pass matmul_dtype=jnp.float32 for an f32-operand
    validation path (the kernel casts activations to M's dtype)."""
    s = cfg["stride"]
    H0, W0 = cfg["decoder_input_size"]

    fc_wT = jnp.asarray(np.asarray(params["fc_w"], np.float32).T)     # (latent, fc_out)
    fc_b = jnp.asarray(np.asarray(params["fc_b"], np.float32).reshape(1, -1))
    flat = [fc_wT, fc_b]

    h, w = H0, W0
    for lp in params["layers"]:
        nh, nw = lp["next_hw"]
        Cout = lp["w"].shape[1]
        R = nh * nw
        M = build_convT_pad_matrix(lp["w"], h, w, s, nh, nw)
        bias_row = np.repeat(np.asarray(lp["b"], np.float32), R).reshape(1, Cout * R)
        gamma_row = np.asarray(lp["gamma"], np.float32).reshape(1, Cout * R)
        beta_row = np.asarray(lp["beta"], np.float32).reshape(1, Cout * R)
        flat += [jnp.asarray(M, matmul_dtype), jnp.asarray(bias_row),
                 jnp.asarray(gamma_row), jnp.asarray(beta_row)]
        h, w = nh, nw

    nh, nw = cfg["image_size"]
    Coutf = params["final_w"].shape[1]
    Rf = nh * nw
    Mf = build_convT_pad_matrix(params["final_w"], h, w, s, nh, nw)
    bias_f = np.repeat(np.asarray(params["final_b"], np.float32), Rf).reshape(1, Coutf * Rf)
    flat += [jnp.asarray(Mf, matmul_dtype), jnp.asarray(bias_f)]

    # Guardrail: everything must stay comfortably inside scoped VMEM
    # (32 MiB default; v7x has 64 MiB physical).  See TODO(synk) above.
    total_bytes = sum(int(np.prod(a.shape)) * a.dtype.itemsize for a in flat)
    assert total_bytes < 16 * 1024 * 1024, (
        f"fused-decoder params ({total_bytes} B) too large for single-shot VMEM "
        "residency; switch to the tiled tap-accumulation path.")

    return tuple(flat), (Coutf, nh, nw)


# ----------------------------- decoder param init ------------------------------

def calc_size_layer(layer_num, num_layers, K, s, image_size):
    h, w = image_size
    for _ in range(num_layers - layer_num - 1):
        h = (h - K) // s + 1
        w = (w - K) // s + 1
    return h, w


def init_decoder_params(key, *, output_channels, hidden_size, num_layers,
                        latent_dim, decoder_input_size, kernel_size, stride,
                        image_size):
    keys = iter(jax.random.split(key, 4 + 4 * num_layers))
    H0, W0 = decoder_input_size
    fc_out = hidden_size * H0 * W0
    params = {
        "fc_w": 0.2 * jax.random.normal(next(keys), (fc_out, latent_dim), jnp.float32),
        "fc_b": 0.1 * jax.random.normal(next(keys), (fc_out,), jnp.float32),
        "layers": [],
    }
    for ln in range(num_layers - 1):
        nh, nw = calc_size_layer(ln, num_layers, kernel_size, stride, image_size)
        params["layers"].append({
            "w": 0.2 * jax.random.normal(
                next(keys), (hidden_size, hidden_size, kernel_size, kernel_size),
                jnp.float32),
            "b": 0.05 * jax.random.normal(next(keys), (hidden_size,), jnp.float32),
            "gamma": 1.0 + 0.1 * jax.random.normal(
                next(keys), (hidden_size, nh, nw), jnp.float32),
            "beta": 0.05 * jax.random.normal(
                next(keys), (hidden_size, nh, nw), jnp.float32),
            "next_hw": (nh, nw),
        })
    params["final_w"] = 0.2 * jax.random.normal(
        next(keys), (hidden_size, output_channels, kernel_size, kernel_size),
        jnp.float32)
    params["final_b"] = 0.05 * jax.random.normal(
        next(keys), (output_channels,), jnp.float32)
    return params


# --------------------------- numpy reference (f64) -----------------------------

def np_reference(z, params, cfg):
    K, s = cfg["kernel_size"], cfg["stride"]
    hid = cfg["hidden_size"]
    H0, W0 = cfg["decoder_input_size"]
    eps = 1e-5
    z = np.asarray(z, np.float64)
    x = z @ np.asarray(params["fc_w"], np.float64).T + np.asarray(params["fc_b"], np.float64)
    B = z.shape[0]
    x = x.reshape(B, hid, H0, W0)

    def conv_t(x, w, b):
        Bn, Cin, H, W = x.shape
        Cout = w.shape[1]
        Ho, Wo = (H - 1) * s + K, (W - 1) * s + K
        out = np.zeros((Bn, Cout, Ho, Wo), np.float64)
        for bi in range(Bn):
            for ic in range(Cin):
                for ih in range(H):
                    for iw in range(W):
                        out[bi, :, ih * s:ih * s + K, iw * s:iw * s + K] += \
                            x[bi, ic, ih, iw] * w[ic]
        return out + b.reshape(1, Cout, 1, 1)

    def rep_pad(x, ph, pw):
        return np.pad(x, ((0, 0), (0, 0), (0, ph), (0, pw)), mode="edge")

    for lp in params["layers"]:
        nh, nw = lp["next_hw"]
        y = conv_t(x, np.asarray(lp["w"], np.float64), np.asarray(lp["b"], np.float64))
        y = rep_pad(y, nh - y.shape[2], nw - y.shape[3])
        m = y.mean(axis=(1, 2, 3), keepdims=True)
        v = y.var(axis=(1, 2, 3), keepdims=True)
        y = (y - m) / np.sqrt(v + eps) * np.asarray(lp["gamma"], np.float64)[None] \
            + np.asarray(lp["beta"], np.float64)[None]
        x = np.maximum(y, 0.0)

    nh, nw = cfg["image_size"]
    y = conv_t(x, np.asarray(params["final_w"], np.float64),
               np.asarray(params["final_b"], np.float64))
    y = rep_pad(y, nh - y.shape[2], nw - y.shape[3])
    return (1.0 / (1.0 + np.exp(-y))).astype(np.float32)


# --------------------------------- main -----------------------------------------

if __name__ == "__main__":
    cfg = dict(output_channels=3, hidden_size=8, num_layers=3, latent_dim=16,
               kernel_size=3, stride=2, image_size=(16, 16))
    # decoder_input_size mirrors an encoder that downsamples num_layers times.
    h, w = cfg["image_size"]
    for _ in range(cfg["num_layers"]):
        h = (h - cfg["kernel_size"]) // cfg["stride"] + 1
        w = (w - cfg["kernel_size"]) // cfg["stride"] + 1
    cfg["decoder_input_size"] = (h, w)  # -> (1, 1)

    key = jax.random.PRNGKey(0)
    pkey, zkey = jax.random.split(key)
    params = init_decoder_params(pkey, **cfg)
    flat_params, (Cf, Hf, Wf) = prepare_params(params, cfg)   # host-side, once

    B = 2
    z = jax.random.normal(zkey, (B, cfg["latent_dim"]), jnp.float32)

    fwd = make_decoder_forward(num_ln_layers=cfg["num_layers"] - 1,
                               out_dim=Cf * Hf * Wf)
    out = fwd(z, *flat_params)
    out = jax.block_until_ready(out)
    out = np.asarray(out).reshape(B, Cf, Hf, Wf)               # free metadata reshape

    ref = np_reference(z, params, cfg)
    assert out.shape == ref.shape == (B, cfg["output_channels"], *cfg["image_size"])
    # bf16 MXU operands (f32 accumulation); use prepare_params(..., jnp.float32)
    # for a full-precision validation path.
    np.testing.assert_allclose(out, ref, rtol=2e-2, atol=2e-2)
    print("KERNEL_OK")
</pallas_src>

<mosaic_0001>
module attributes {stable_mosaic.version = 11 : i64} {
  func.func @_fused_decoder_kernel(%arg0: memref<2x16xf32, #tpu.memory_space<vmem>>, %arg1: memref<16x8xf32, #tpu.memory_space<vmem>>, %arg2: memref<1x8xf32, #tpu.memory_space<vmem>>, %arg3: memref<8x72xbf16, #tpu.memory_space<vmem>>, %arg4: memref<1x72xf32, #tpu.memory_space<vmem>>, %arg5: memref<1x72xf32, #tpu.memory_space<vmem>>, %arg6: memref<1x72xf32, #tpu.memory_space<vmem>>, %arg7: memref<72x392xbf16, #tpu.memory_space<vmem>>, %arg8: memref<1x392xf32, #tpu.memory_space<vmem>>, %arg9: memref<1x392xf32, #tpu.memory_space<vmem>>, %arg10: memref<1x392xf32, #tpu.memory_space<vmem>>, %arg11: memref<392x768xbf16, #tpu.memory_space<vmem>>, %arg12: memref<1x768xf32, #tpu.memory_space<vmem>>, %arg13: memref<2x768xf32, #tpu.memory_space<vmem>>) attributes {dimension_semantics = [], scalar_prefetch = 0 : i64, scratch_operands = 0 : i64, tpu.core_type = #tpu.core_type<tc>} {
    %c0 = arith.constant 0 : index
    %c0_0 = arith.constant 0 : index
    %0 = vector.load %arg0[%c0, %c0_0] : memref<2x16xf32, #tpu.memory_space<vmem>>, vector<2x16xf32>
    %c0_1 = arith.constant 0 : index
    %c0_2 = arith.constant 0 : index
    %1 = vector.load %arg1[%c0_1, %c0_2] : memref<16x8xf32, #tpu.memory_space<vmem>>, vector<16x8xf32>
    %cst = arith.constant dense<0.000000e+00> : vector<2x8xf32>
    %2 = tpu.matmul %0, %1, %cst {dimension_numbers = #tpu.dot_dimension_numbers<[1], [0], [0], [1], [0, 0, 1, 1], [], []>} : vector<2x16xf32>, vector<16x8xf32>, vector<2x8xf32> -> vector<2x8xf32>
    %c0_3 = arith.constant 0 : index
    %c0_4 = arith.constant 0 : index
    %3 = vector.load %arg2[%c0_3, %c0_4] : memref<1x8xf32, #tpu.memory_space<vmem>>, vector<1x8xf32>
    %4 = vector.broadcast %3 : vector<1x8xf32> to vector<2x8xf32>
    %5 = arith.addf %2, %4 : vector<2x8xf32>
    %c0_5 = arith.constant 0 : index
    %c0_6 = arith.constant 0 : index
    %6 = vector.load %arg3[%c0_5, %c0_6] : memref<8x72xbf16, #tpu.memory_space<vmem>>, vector<8x72xbf16>
    %7 = arith.truncf %5 : vector<2x8xf32> to vector<2x8xbf16>
    %cst_7 = arith.constant dense<0.000000e+00> : vector<2x72xf32>
    %8 = tpu.matmul %7, %6, %cst_7 {dimension_numbers = #tpu.dot_dimension_numbers<[1], [0], [0], [1], [0, 0, 1, 1], [], []>} : vector<2x8xbf16>, vector<8x72xbf16>, vector<2x72xf32> -> vector<2x72xf32>
    %c0_8 = arith.constant 0 : index
    %c0_9 = arith.constant 0 : index
    %9 = vector.load %arg4[%c0_8, %c0_9] : memref<1x72xf32, #tpu.memory_space<vmem>>, vector<1x72xf32>
    %10 = vector.broadcast %9 : vector<1x72xf32> to vector<2x72xf32>
    %11 = arith.addf %8, %10 : vector<2x72xf32>
    %cst_10 = arith.constant dense<0.000000e+00> : vector<2xf32>
    %12 = vector.multi_reduction <add>, %11, %cst_10 [1] : vector<2x72xf32> to vector<2xf32>
    %13 = vector.shape_cast %12 : vector<2xf32> to vector<2x1xf32>
    %cst_11 = arith.constant 7.200000e+01 : f32
    %14 = vector.broadcast %cst_11 : f32 to vector<2x1xf32>
    %15 = arith.divf %13, %14 : vector<2x1xf32>
    %16 = vector.broadcast %15 : vector<2x1xf32> to vector<2x72xf32>
    %17 = arith.subf %11, %16 : vector<2x72xf32>
    %18 = arith.mulf %17, %17 : vector<2x72xf32>
    %cst_12 = arith.constant dense<0.000000e+00> : vector<2xf32>
    %19 = vector.multi_reduction <add>, %18, %cst_12 [1] : vector<2x72xf32> to vector<2xf32>
    %20 = vector.shape_cast %19 : vector<2xf32> to vector<2x1xf32>
    %cst_13 = arith.constant 7.200000e+01 : f32
    %21 = vector.broadcast %cst_13 : f32 to vector<2x1xf32>
    %22 = arith.divf %20, %21 : vector<2x1xf32>
    %cst_14 = arith.constant 9.99999974E-6 : f32
    %23 = vector.broadcast %cst_14 : f32 to vector<2x1xf32>
    %24 = arith.addf %22, %23 : vector<2x1xf32>
    %25 = math.rsqrt %24 : vector<2x1xf32>
    %26 = vector.broadcast %25 : vector<2x1xf32> to vector<2x72xf32>
    %27 = arith.mulf %17, %26 : vector<2x72xf32>
    %c0_15 = arith.constant 0 : index
    %c0_16 = arith.constant 0 : index
    %28 = vector.load %arg5[%c0_15, %c0_16] : memref<1x72xf32, #tpu.memory_space<vmem>>, vector<1x72xf32>
    %29 = vector.broadcast %28 : vector<1x72xf32> to vector<2x72xf32>
    %30 = arith.mulf %27, %29 : vector<2x72xf32>
    %c0_17 = arith.constant 0 : index
    %c0_18 = arith.constant 0 : index
    %31 = vector.load %arg6[%c0_17, %c0_18] : memref<1x72xf32, #tpu.memory_space<vmem>>, vector<1x72xf32>
    %32 = vector.broadcast %31 : vector<1x72xf32> to vector<2x72xf32>
    %33 = arith.addf %30, %32 : vector<2x72xf32>
    %cst_19 = arith.constant 0.000000e+00 : f32
    %34 = vector.broadcast %cst_19 : f32 to vector<2x72xf32>
    %35 = arith.maximumf %33, %34 : vector<2x72xf32>
    %c0_20 = arith.constant 0 : index
    %c0_21 = arith.constant 0 : index
    %36 = vector.load %arg7[%c0_20, %c0_21] : memref<72x392xbf16, #tpu.memory_space<vmem>>, vector<72x392xbf16>
    %37 = arith.truncf %35 : vector<2x72xf32> to vector<2x72xbf16>
    %cst_22 = arith.constant dense<0.000000e+00> : vector<2x392xf32>
    %38 = tpu.matmul %37, %36, %cst_22 {dimension_numbers = #tpu.dot_dimension_numbers<[1], [0], [0], [1], [0, 0, 1, 1], [], []>} : vector<2x72xbf16>, vector<72x392xbf16>, vector<2x392xf32> -> vector<2x392xf32>
    %c0_23 = arith.constant 0 : index
    %c0_24 = arith.constant 0 : index
    %39 = vector.load %arg8[%c0_23, %c0_24] : memref<1x392xf32, #tpu.memory_space<vmem>>, vector<1x392xf32>
    %40 = vector.broadcast %39 : vector<1x392xf32> to vector<2x392xf32>
    %41 = arith.addf %38, %40 : vector<2x392xf32>
    %cst_25 = arith.constant dense<0.000000e+00> : vector<2xf32>
    %42 = vector.multi_reduction <add>, %41, %cst_25 [1] : vector<2x392xf32> to vector<2xf32>
    %43 = vector.shape_cast %42 : vector<2xf32> to vector<2x1xf32>
    %cst_26 = arith.constant 3.920000e+02 : f32
    %44 = vector.broadcast %cst_26 : f32 to vector<2x1xf32>
    %45 = arith.divf %43, %44 : vector<2x1xf32>
    %46 = vector.broadcast %45 : vector<2x1xf32> to vector<2x392xf32>
    %47 = arith.subf %41, %46 : vector<2x392xf32>
    %48 = arith.mulf %47, %47 : vector<2x392xf32>
    %cst_27 = arith.constant dense<0.000000e+00> : vector<2xf32>
    %49 = vector.multi_reduction <add>, %48, %cst_27 [1] : vector<2x392xf32> to vector<2xf32>
    %50 = vector.shape_cast %49 : vector<2xf32> to vector<2x1xf32>
    %cst_28 = arith.constant 3.920000e+02 : f32
    %51 = vector.broadcast %cst_28 : f32 to vector<2x1xf32>
    %52 = arith.divf %50, %51 : vector<2x1xf32>
    %cst_29 = arith.constant 9.99999974E-6 : f32
    %53 = vector.broadcast %cst_29 : f32 to vector<2x1xf32>
    %54 = arith.addf %52, %53 : vector<2x1xf32>
    %55 = math.rsqrt %54 : vector<2x1xf32>
    %56 = vector.broadcast %55 : vector<2x1xf32> to vector<2x392xf32>
    %57 = arith.mulf %47, %56 : vector<2x392xf32>
    %c0_30 = arith.constant 0 : index
    %c0_31 = arith.constant 0 : index
    %58 = vector.load %arg9[%c0_30, %c0_31] : memref<1x392xf32, #tpu.memory_space<vmem>>, vector<1x392xf32>
    %59 = vector.broadcast %58 : vector<1x392xf32> to vector<2x392xf32>
    %60 = arith.mulf %57, %59 : vector<2x392xf32>
    %c0_32 = arith.constant 0 : index
    %c0_33 = arith.constant 0 : index
    %61 = vector.load %arg10[%c0_32, %c0_33] : memref<1x392xf32, #tpu.memory_space<vmem>>, vector<1x392xf32>
    %62 = vector.broadcast %61 : vector<1x392xf32> to vector<2x392xf32>
    %63 = arith.addf %60, %62 : vector<2x392xf32>
    %cst_34 = arith.constant 0.000000e+00 : f32
    %64 = vector.broadcast %cst_34 : f32 to vector<2x392xf32>
    %65 = arith.maximumf %63, %64 : vector<2x392xf32>
    %c0_35 = arith.constant 0 : index
    %c0_36 = arith.constant 0 : index
    %66 = vector.load %arg11[%c0_35, %c0_36] : memref<392x768xbf16, #tpu.memory_space<vmem>>, vector<392x768xbf16>
    %67 = arith.truncf %65 : vector<2x392xf32> to vector<2x392xbf16>
    %cst_37 = arith.constant dense<0.000000e+00> : vector<2x768xf32>
    %68 = tpu.matmul %67, %66, %cst_37 {dimension_numbers = #tpu.dot_dimension_numbers<[1], [0], [0], [1], [0, 0, 1, 1], [], []>} : vector<2x392xbf16>, vector<392x768xbf16>, vector<2x768xf32> -> vector<2x768xf32>
    %c0_38 = arith.constant 0 : index
    %c0_39 = arith.constant 0 : index
    %69 = vector.load %arg12[%c0_38, %c0_39] : memref<1x768xf32, #tpu.memory_space<vmem>>, vector<1x768xf32>
    %70 = vector.broadcast %69 : vector<1x768xf32> to vector<2x768xf32>
    %71 = arith.addf %68, %70 : vector<2x768xf32>
    %72 = arith.negf %71 : vector<2x768xf32>
    %73 = math.exp %72 : vector<2x768xf32>
    %cst_40 = arith.constant 1.000000e+00 : f32
    %74 = vector.broadcast %cst_40 : f32 to vector<2x768xf32>
    %75 = arith.addf %74, %73 : vector<2x768xf32>
    %76 = arith.divf %74, %75 : vector<2x768xf32>
    %c0_41 = arith.constant 0 : index
    %c0_42 = arith.constant 0 : index
    %77 = vector.load %arg13[%c0_41, %c0_42] : memref<2x768xf32, #tpu.memory_space<vmem>>, vector<2x768xf32>
    tpu.vector_store %arg13[%c0_41, %c0_42], %76 {strides = array<i32>} : memref<2x768xf32, #tpu.memory_space<vmem>>, vector<2x768xf32>,
    return
  }
}

</mosaic_0001>

<bundles_post_ra>
// kernel: fwd.1
= control target key start
LH: loop header
LB: loop body
LE: loop exit
PB: predicated region body
PF: predicated region fallthrough
CT: control target
= control target key end

     0   :  { %18 = vsyncpa [#allocation3], 0  ;;  %s2696_s0 = inlined_call_operand.vmem [shape: f32[2,16], index: 0, kind: input, shape index: {}]   ;;  %s2697_s1 = inlined_call_operand.vmem [shape: f32[16,8], index: 1, kind: input, shape index: {}]   ;;  %s2698_s2 = inlined_call_operand.vmem [shape: f32[1,8], index: 2, kind: input, shape index: {}]   ;;  %s2699_s3 = inlined_call_operand.vmem [shape: bf16[8,72], index: 3, kind: input, shape index: {}]   ;;  %s2700_s4 = inlined_call_operand.vmem [shape: f32[1,72], index: 4, kind: input, shape index: {}]   ;;  %s2701_s5 = inlined_call_operand.vmem [shape: f32[1,72], index: 5, kind: input, shape index: {}]   ;;  %s2702_s6 = inlined_call_operand.vmem [shape: f32[1,72], index: 6, kind: input, shape index: {}]   ;;  %s2703_s7 = inlined_call_operand.hbm [shape: bf16[72,392], index: 7, kind: input, shape index: {}]   ;;  %s2704_s8 = inlined_call_operand.vmem [shape: f32[1,392], index: 8, kind: input, shape index: {}]   ;;  %s2705_s9 = inlined_call_operand.vmem [shape: f32[1,392], index: 9, kind: input, shape index: {}]   ;;  %s2706_s10 = inlined_call_operand.vmem [shape: f32[1,392], index: 10, kind: input, shape index: {}]   ;;  %s2707_s11 = inlined_call_operand.hbm [shape: bf16[392,768], index: 11, kind: input, shape index: {}]   ;;  %s2708_s12 = inlined_call_operand.vmem [shape: f32[1,768], index: 12, kind: input, shape index: {}]   ;;  %s2709_s13 = inlined_call_operand.hbm [shape: f32[2,768], index: 13, kind: output, shape index: {}]  }
   0x1   :  { %19 = vsyncpa [#allocation6], 0 }
   0x2   :  { %20 = vsyncpa [#allocation4], 0  ;;  %s2433_s25 = smov [#allocation2]   ;;  %s2361_s29 = scalar_lea.hbm %s2703_s7, 2304 }
   0x3   :  { %s40_s26 = sshll.u32 %s2433_s25, 4  ;;  %p2362_p0 = scmp.ne.s32.totalorder %s2703_s7, %s2361_s29  ;;  %s41_s26 = int_to_ptr.vmem [resolvable:$true] %s40_s26 }
   0x4   :  { %p2365_p1 = scmp.lt.u32.totalorder %s2361_s29, %s2703_s7 }
   0x6   :  { %p2367_p2 = pnand %p2365_p1, %p2362_p0 }
   0x8   :  { %2370 = shalt.err (!%p2367_p2)
}
   0x9   :  { %s2371_s17 = scalar_lea.vmem %s41_s26, 2304  ;;  %p2376_p4 = scmp.lt.s32.totalorder %s41_s26, %s41_s26 }
   0xa   :  { %p2372_p3 = scmp.ne.s32.totalorder %s41_s26, %s2371_s17  ;;  %p2377_p5 = scmp.lt.s32.totalorder %s2371_s17, %s2371_s17 }
   0xc   :  { %p2378_p6 = por %p2377_p5, %p2376_p4 }
   0xe   :  { %p2379_p7 = pnand %p2378_p6, %p2372_p3 }
  0x10   :  { %2382 = shalt.err (!%p2379_p7)
}
  0x11   :  { %s2434_s18 = smov 256   ;;  %s2435_s19 = smov 16  }
  0x12   :  { %46 = dma.hbm_to_vmem [thread:$0]  %s2703_s7, 2304, %s41_s26, [#allocation3], %s2434_s18, %s2434_s18, %s2435_s19  }
  0x13   :  { %s2436_s22 = smov [#allocation5]   ;;  %s2383_s27 = scalar_lea.hbm %s2707_s11, 18816 }
  0x14   :  { %s58_s23 = sshll.u32 %s2436_s22, 4  ;;  %p2384_p8 = scmp.ne.s32.totalorder %s2707_s11, %s2383_s27  ;;  %s59_s23 = int_to_ptr.vmem [resolvable:$true] %s58_s23 }
  0x15   :  { %p2387_p9 = scmp.lt.u32.totalorder %s2383_s27, %s2707_s11 }
  0x17   :  { %p2389_p10 = pnand %p2387_p9, %p2384_p8 }
  0x19   :  { %2392 = shalt.err (!%p2389_p10)
}
  0x1a   :  { %s2393_s15 = scalar_lea.vmem %s59_s23, 18816  ;;  %p2398_p12 = scmp.lt.s32.totalorder %s59_s23, %s59_s23 }
  0x1b   :  { %p2394_p11 = scmp.ne.s32.totalorder %s59_s23, %s2393_s15  ;;  %p2399_p13 = scmp.lt.s32.totalorder %s2393_s15, %s2393_s15 }
  0x1d   :  { %p2400_p0 = por %p2399_p13, %p2398_p12 }
  0x1f   :  { %p2401_p1 = pnand %p2400_p0, %p2394_p11 }
  0x21   :  { %2404 = shalt.err (!%p2401_p1)
}
  0x22   :  { %s2437_s7 = smov 384   ;;  %s2438_s26 = smov 24  }
  0x23   :  { %64 = dma.hbm_to_vmem [thread:$0]  %s2707_s11, 18816, %s59_s23, [#allocation6], %s2437_s7, %s2437_s7, %s2438_s26  }
  0x24   :  { %2427 = dma.done.wait [#allocation3], 2304  }
  0x25   :  { %2428 = vsyncadd [#allocation3], 4294964992 }
  0x26   :  { %2429 = dma.done.wait [#allocation6], 18816  }
  0x27   :  { %2430 = vsyncadd [#allocation6], 4294948480  ;;  %v2439_v0 = vmov 0.0|0.0   ;;  %vm2440_vm0 = vmmov 0   ;;  %v2441_v1 = vmov 0.0   ;;  %v75_v2 = vld [vmem:[%s2697_s1] sm:$0xff]  ;;  %v268_v61 = vlaneseq }
  0x28   :  { %2052 = vmatprep.subr.bf16.mxu1 %v2439_v0  ;;  %2043 = vmatprep.mubr.msk.f32.mxu1 %vm2440_vm0, %v2441_v1  ;;  %v76_v3 = vld [vmem:[%s2697_s1 + $0x8] sm:$0xff]  ;;  %v74_v5 = vld [vmem:[%s2696_s0] sm:$0x3]  ;;  %vm84_vm1 = vcmask 130048   ;;  %vm171_vm2 = vcmask 1043456   ;;  %vm167_vm3 = vcmask 64512  }
  0x29   :  { %v2053_v4 = vpack.c.bf16 %v76_v3, %v75_v2  ;;  %v158_v6 = vld [vmem:[%s2699_s3] sm:$0xf]  ;;  %vm215_vm4 = vcmask 582656   ;;  %v2083_v25 = vld [vmem:[#allocation2 + $0x4] ss:$16 sps:$4 sm:$0xff]   ;;  %v2442_v36 = vmov 0  }
  0x2a   :  { %v173_v7 = vsel %vm171_vm2, %v158_v6, 0  ;;  %v1841_v8 = vld [vmem:[%s2698_s2] ss:$0 sm:$0xff]  ;;  %394 = vmatprep.subr.bf16.mxu0 %v2083_v25  ;;  %v2086_v27 = vld [vmem:[#allocation2 + $0x24] ss:$16 sps:$4 sm:$0xff]   ;;  %426 = vmatprep.mubr.bf16.mxu0 %v2442_v36  ;;  %vm378_vm5 = vcmask 588800  }
  0x2b   :  { %2054 = vmatpush3.bf16.msra.mxu1 %v2053_v4  ;;  %v1843_v13 = vld [vmem:[%s2700_s4] ss:$0 sm:$0xff]  ;;  %v2089_v29 = vld [vmem:[#allocation2 + $0x44] ss:$16 sps:$4 sm:$0xff]   ;;  %v2099_v38 = vld [vmem:[#allocation2 + $0xc] ss:$16 sps:$4 sm:$0xff]  }
  0x2c   :  { %2046 = vmatprep.subr.bf16.mxu1 %v2441_v1  ;;  %v2085_v26 = vld [vmem:[#allocation2] ss:$16 sps:$4 sm:$0xff]   ;;  %v2092_v31 = vld [vmem:[#allocation2 + $0x64] ss:$16 sps:$4 sm:$0xff]   ;;  %v2097_v49 = vld [vmem:[#allocation2 + $0x8] ss:$16 sps:$4 sm:$0xff]  }
  0x2d   :  { %395 = vmatpush1.bf16.msra.mxu0 %v2085_v26  ;;  %v2088_v28 = vld [vmem:[#allocation2 + $0x20] ss:$16 sps:$4 sm:$0xff]   ;;  %v2102_v51 = vld [vmem:[#allocation2 + $0x2c] ss:$16 sps:$4 sm:$0xff]   ;;  %v2100_v52 = vld [vmem:[#allocation2 + $0x28] ss:$16 sps:$4 sm:$0xff]  }
  0x2e   :  { %2044 = vmatmul.mubr.msk.f32.vlgmr.msra.gmra.mrb[0].mxu1 %vm84_vm1, %v74_v5  ;;  %396 = vmatprep.subr.bf16.mxu0 %v2086_v27  ;;  %v2091_v30 = vld [vmem:[#allocation2 + $0x40] ss:$16 sps:$4 sm:$0xff]   ;;  %v2105_v53 = vld [vmem:[#allocation2 + $0x4c] ss:$16 sps:$4 sm:$0xff]   ;;  %v2103_v54 = vld [vmem:[#allocation2 + $0x48] ss:$16 sps:$4 sm:$0xff]  }
  0x2f   :  { %2048 = vmatprep.mubr.msk.bf16.mxu1 %vm2440_vm0, %v2441_v1  ;;  %2047 = vmatpush3.bf16.msra.mxu1 %v173_v7  ;;  %v2094_v32 = vld [vmem:[#allocation2 + $0x60] ss:$16 sps:$4 sm:$0xff]   ;;  %v2108_v55 = vld [vmem:[#allocation2 + $0x6c] ss:$16 sps:$4 sm:$0xff]   ;;  %v2106_v57 = vld [vmem:[#allocation2 + $0x68] ss:$16 sps:$4 sm:$0xff]  }
  0x30   :  { %v263_v33 = vld [vmem:[#allocation2 + $0x80] sm:$0xff]  ;;  %v264_v56 = vld [vmem:[#allocation2 + $0x88] sm:$0xff]  ;;  %v2571_v1 = vshrl.u32 %v268_v61, 7  ;;  %vm476_vm6 = vcmask 1041408   ;;  %vm482_vm7 = vcmask 58368  }
  0x31   :  { %397 = vmatpush1.bf16.msra.mxu0 %v2088_v28  ;;  %v1864_v34 = vcombine.high %v263_v33, %v263_v33  ;;  %v1863_v35 = vcombine.low %v263_v33, %v263_v33  ;;  %v1845_v43 = vld [vmem:[%s2701_s5] ss:$0 sm:$0xff]  ;;  %v1866_v58 = vcombine.high %v264_v56, %v264_v56  ;;  %v1865_v59 = vcombine.low %v264_v56, %v264_v56  ;;  %v2111_v27 = vld [vmem:[#allocation5] ss:$24 sps:$4 sm:$0xff]   ;;  %v2113_v28 = vld [vmem:[#allocation5 + $0x4] ss:$24 sps:$4 sm:$0xff]  }
  0x32   :  { %398 = vmatprep.subr.bf16.mxu0 %v2089_v29  ;;  %v1846_v45 = vld [vmem:[%s2702_s6] ss:$0 sm:$0xff]  ;;  %v2574_v3 = vsub.s32 0, %v2571_v1  ;;  %v2577_v4 = vsub.s32 1, %v2571_v1  ;;  %v2116_v29 = vld [vmem:[#allocation5 + $0x34] ss:$24 sps:$4 sm:$0xff]   ;;  %1508 = vmatprep.subr.bf16.mxu1 %v2113_v28 }
  0x33   :  { %v383_v37 = vsel %vm171_vm2, %v1863_v35, 0  ;;  %v389_v60 = vsel %vm171_vm2, %v1865_v59, 0  ;;  %v266_v5 = vld [vmem:[%s2704_s8] sm:$0xf]  ;;  %v2137_v33 = vld [vmem:[#allocation5 + $0x304] ss:$24 sps:$4 sm:$0xff]  }
  0x34   :  { %v271_v6 = vrot.slane %v266_v5, %v2574_v3  ;;  %v275_v7 = vrot.slane %v266_v5, %v2577_v4  ;;  %v2143_v35 = vld [vmem:[#allocation5 + $0x334] ss:$24 sps:$4 sm:$0xff]  }
  0x35   :  { %399 = vmatpush1.bf16.msra.mxu0 %v2091_v30  ;;  %v2114_v30 = vld [vmem:[#allocation5 + $0x30] ss:$24 sps:$4 sm:$0xff]   ;;  %v2179_v28 = vld [vmem:[#allocation5 + $0x454] ss:$24 sps:$4 sm:$0xff]  }
  0x36   :  { %400 = vmatprep.subr.bf16.mxu0 %v2092_v31  ;;  %v2119_v31 = vld [vmem:[#allocation5 + $0x64] ss:$24 sps:$4 sm:$0xff]  }
  0x39   :  { %401 = vmatpush1.bf16.msra.mxu0 %v2094_v32  ;;  %v2135_v32 = vld [vmem:[#allocation5 + $0x300] ss:$24 sps:$4 sm:$0xff]  }
  0x3a   :  { %1867 = vmatprep.subr.msk.bf16.mxu0 %vm171_vm2, %v1864_v34  ;;  %v2117_v34 = vld [vmem:[#allocation5 + $0x60] ss:$24 sps:$4 sm:$0xff]  }
  0x3d   :  { %403 = vmatpush1.bf16.msra.mxu0 %v383_v37  ;;  %v2141_v37 = vld [vmem:[#allocation5 + $0x330] ss:$24 sps:$4 sm:$0xff]  }
  0x3e   :  { %435 = vmatprep.subr.bf16.mxu0 %v2099_v38  ;;  %v2149_v38 = vld [vmem:[#allocation5 + $0x364] ss:$24 sps:$4 sm:$0xff]  }
 0x101   :  { %v154_v9 = vpop.f32.mrb[0].mxu1 }
 0x102   :  { %v155_v10 = vadd.f32 %v1841_v8, %v154_v9  ;;  %v2045_v11 = vpop.f32.mrb[1].mxu1  ;;  %v2585_v8 = vsub.s32 2, %v2571_v1  ;;  %v2588_v9 = vsub.s32 3, %v2571_v1 }
 0x104   :  { %v159_v12 = vpack.c.bf16 %v155_v10, %v155_v10 }
 0x106   :  { %2049 = vmatmul.mubr.msk.bf16.vlgmr.msra.gmra.mrb[4].mxu1 %vm167_vm3, %v159_v12  ;;  %v279_v12 = vrot.slane %v266_v5, %v2585_v8 }
 0x107   :  { %1509 = vmatpush1.bf16.msra.mxu1 %v2111_v27  ;;  %v2176_v27 = vld [vmem:[#allocation5 + $0x2a4] ss:$24 sps:$4 sm:$0xff]  }
 0x108   :  { %1510 = vmatprep.subr.bf16.mxu1 %v2116_v29  ;;  %v713_v29 = vld [vmem:[#allocation5 + $0x480] sm:$0xff] }
 0x10b   :  { %1511 = vmatpush1.bf16.msra.mxu1 %v2114_v30  ;;  %v2174_v30 = vld [vmem:[#allocation5 + $0x2a0] ss:$24 sps:$4 sm:$0xff]  }
 0x10c   :  { %1512 = vmatprep.subr.bf16.mxu1 %v2119_v31  ;;  %v2177_v31 = vld [vmem:[#allocation5 + $0x450] ss:$24 sps:$4 sm:$0xff]  }
 0x10f   :  { %1513 = vmatpush1.bf16.msra.mxu1 %v2117_v34  ;;  %v2015_v34 = vcombine.low %v713_v29, %v713_v29 }
 0x1d9   :  { %v209_v14 = vpop.f32.mrb[4].mxu1 }
 0x1da   :  { %v210_v15 = vadd.f32 %v1843_v13, %v209_v14  ;;  %v2050_v16 = vpop.f32.mrb[5].mxu1  ;;  %v283_v13 = vrot.slane %v266_v5, %v2588_v9 }
 0x1db   :  { %v212_v17 = vpop.f32.mrb[6].mxu1 }
 0x1dc   :  { %v2051_v18 = vpop.f32.mrb[7].mxu1  ;;  %v216_v19 = vsel %vm215_vm4, %v210_v15, 0.0 }
 0x1dd   :  { %217 = vadd.xlane.f32.xlu0 %v216_v19 }
 0x26a   :  { %v218_v20 = vpop.xlane.xlu0 %217 }
 0x26b   :  { %v220_v21 = vmul.f32 0.013888889, %v218_v20 }
 0x26d   :  { %v221_v22 = vsub.f32 %v210_v15, %v220_v21 }
 0x26f   :  { %v222_v23 = vmul.f32 %v221_v22, %v221_v22 }
 0x271   :  { %v223_v24 = vsel %vm215_vm4, %v222_v23, 0.0 }
 0x272   :  { %224 = vadd.xlane.f32.xlu0 %v223_v24 }
 0x2ff   :  { %v225_v39 = vpop.xlane.xlu0 %224 }
 0x300   :  { %v226_v40 = vmul.f32 0.013888889, %v225_v39  ;;  %v2120_v39 = vld [vmem:[#allocation5 + $0x90] ss:$24 sps:$4 sm:$0xff]  }
 0x302   :  { %v227_v41 = vadd.f32 1e-05, %v226_v40  ;;  %v2125_v40 = vld [vmem:[#allocation5 + $0xc4] ss:$24 sps:$4 sm:$0xff]  }
 0x304   :  { %2333 = vrsqrt.f32 %v227_v41  ;;  %v2147_v41 = vld [vmem:[#allocation5 + $0x360] ss:$24 sps:$4 sm:$0xff]  }
 0x30e   :  { %v2334_v42 = vpop.eup %2333 }
 0x30f   :  { %v229_v44 = vmul.f32 %v2334_v42, %v221_v22  ;;  %v2123_v42 = vld [vmem:[#allocation5 + $0xc0] ss:$24 sps:$4 sm:$0xff]  }
 0x311   :  { %v237_v46 = vmul.f32 %v1845_v43, %v229_v44  ;;  %v2128_v43 = vld [vmem:[#allocation5 + $0xf4] ss:$24 sps:$4 sm:$0xff]   ;;  %v2126_v44 = vld [vmem:[#allocation5 + $0xf0] ss:$24 sps:$4 sm:$0xff]  }
 0x313   :  { %v245_v47 = vadd.f32 %v1846_v45, %v237_v46  ;;  %v2131_v45 = vld [vmem:[#allocation5 + $0x124] ss:$24 sps:$4 sm:$0xff]   ;;  %v2129_v46 = vld [vmem:[#allocation5 + $0x120] ss:$24 sps:$4 sm:$0xff]  }
 0x315   :  { %v246_v48 = vmax.f32 %v245_v47, 0.0  ;;  %v2134_v47 = vld [vmem:[#allocation5 + $0x154] ss:$24 sps:$4 sm:$0xff]  }
 0x317   :  { %v265_v50 = vpack.c.bf16 %v246_v48, %v246_v48  ;;  %v2132_v48 = vld [vmem:[#allocation5 + $0x150] ss:$24 sps:$4 sm:$0xff]  }
 0x319   :  { %1868 = vmatmul.mubr.msk.bf16.vlgmr.msra.gmra.mrb[0].mxu0 %vm378_vm5, %v265_v50 }
 0x31a   :  { %436 = vmatpush1.bf16.msra.mxu0 %v2097_v49  ;;  %467 = vmatprep.mubr.bf16.mxu0 %v2442_v36  ;;  %v2122_v36 = vld [vmem:[#allocation5 + $0x94] ss:$24 sps:$4 sm:$0xff]   ;;  %v2140_v49 = vld [vmem:[#allocation5 + $0x184] ss:$24 sps:$4 sm:$0xff]  }
 0x31b   :  { %437 = vmatprep.subr.bf16.mxu0 %v2102_v51  ;;  %1514 = vmatprep.subr.bf16.mxu1 %v2122_v36  ;;  %v2146_v51 = vld [vmem:[#allocation5 + $0x1b4] ss:$24 sps:$4 sm:$0xff]   ;;  %v1491_v36 = vsel %vm171_vm2, %v2015_v34, 0  ;;  %v2215_v34 = vld [vmem:[#allocation5 + $0xf8] ss:$24 sps:$4 sm:$0xff]  }
 0x31c   :  { %1515 = vmatpush1.bf16.msra.mxu1 %v2120_v39 }
 0x31d   :  { %1516 = vmatprep.subr.bf16.mxu1 %v2125_v40 }
 0x31e   :  { %438 = vmatpush1.bf16.msra.mxu0 %v2100_v52  ;;  %v2144_v52 = vld [vmem:[#allocation5 + $0x1b0] ss:$24 sps:$4 sm:$0xff]  }
 0x31f   :  { %439 = vmatprep.subr.bf16.mxu0 %v2105_v53 }
 0x320   :  { %1517 = vmatpush1.bf16.msra.mxu1 %v2123_v42  ;;  %v513_v42 = vld [vmem:[%s2705_s9] sm:$0xf] }
 0x321   :  { %1518 = vmatprep.subr.bf16.mxu1 %v2128_v43  ;;  %v539_v43 = vld [vmem:[%s2706_s10] sm:$0xf] }
 0x322   :  { %440 = vmatpush1.bf16.msra.mxu0 %v2103_v54 }
 0x323   :  { %441 = vmatprep.subr.bf16.mxu0 %v2108_v55 }
 0x324   :  { %1519 = vmatpush1.bf16.msra.mxu1 %v2126_v44  ;;  %v522_v44 = vrot.slane %v513_v42, %v2577_v4 }
 0x325   :  { %1520 = vmatprep.subr.bf16.mxu1 %v2131_v45  ;;  %v530_v45 = vrot.slane %v513_v42, %v2588_v9 }
 0x326   :  { %442 = vmatpush1.bf16.msra.mxu0 %v2106_v57 }
 0x327   :  { %1869 = vmatprep.subr.msk.bf16.mxu0 %vm171_vm2, %v1866_v58 }
 0x328   :  { %1521 = vmatpush1.bf16.msra.mxu1 %v2129_v46  ;;  %v518_v46 = vrot.slane %v513_v42, %v2574_v3 }
 0x329   :  { %1522 = vmatprep.subr.bf16.mxu1 %v2134_v47  ;;  %v526_v47 = vrot.slane %v513_v42, %v2585_v8  ;;  %v2227_v42 = vld [vmem:[#allocation5 + $0x158] ss:$24 sps:$4 sm:$0xff]  }
 0x32a   :  { %444 = vmatpush1.bf16.msra.mxu0 %v389_v60 }
 0x32b   :  { %1549 = vmatprep.subr.bf16.mxu0 %v2137_v33  ;;  %v2016_v33 = vcombine.high %v713_v29, %v713_v29  ;;  %v2214_v29 = vld [vmem:[#allocation5 + $0xd4] ss:$24 sps:$4 sm:$0xff]  }
 0x32c   :  { %1523 = vmatpush1.bf16.msra.mxu1 %v2132_v48 }
 0x32d   :  { %1870 = vmatmul.mubr.msk.bf16.vlgmr.msra.gmra.mrb[4].mxu0 %vm378_vm5, %v265_v50  ;;  %v2138_v50 = vld [vmem:[#allocation5 + $0x180] ss:$24 sps:$4 sm:$0xff]   ;;  %1524 = vmatprep.subr.bf16.mxu1 %v2140_v49  ;;  %v548_v49 = vrot.slane %v539_v43, %v2577_v4 }
 0x32e   :  { %1550 = vmatpush1.bf16.msra.mxu0 %v2135_v32  ;;  %v2182_v32 = vld [vmem:[#allocation5 + $0x2d4] ss:$24 sps:$4 sm:$0xff]  }
 0x32f   :  { %1551 = vmatprep.subr.bf16.mxu0 %v2143_v35  ;;  %v2180_v35 = vld [vmem:[#allocation5 + $0x2d0] ss:$24 sps:$4 sm:$0xff]  }
 0x330   :  { %1525 = vmatpush1.bf16.msra.mxu1 %v2138_v50  ;;  %v556_v50 = vrot.slane %v539_v43, %v2588_v9 }
 0x331   :  { %1526 = vmatprep.subr.bf16.mxu1 %v2146_v51  ;;  %v544_v51 = vrot.slane %v539_v43, %v2574_v3 }
 0x332   :  { %1552 = vmatpush1.bf16.msra.mxu0 %v2141_v37  ;;  %v2187_v37 = vld [vmem:[#allocation5 + $0xc] ss:$24 sps:$4 sm:$0xff]  }
 0x333   :  { %1553 = vmatprep.subr.bf16.mxu0 %v2149_v38  ;;  %v2190_v38 = vld [vmem:[#allocation5 + $0x14] ss:$24 sps:$4 sm:$0xff]  }
 0x334   :  { %1527 = vmatpush1.bf16.msra.mxu1 %v2144_v52  ;;  %v552_v52 = vrot.slane %v539_v43, %v2585_v8  ;;  %v2230_v43 = vld [vmem:[#allocation5 + $0x160] ss:$24 sps:$4 sm:$0xff]  }
 0x336   :  { %1554 = vmatpush1.bf16.msra.mxu0 %v2147_v41 }
 0x3ec   :  { %v428_v62 = vpop.f32.mrb[0].mxu0 }
 0x3ed   :  { %v430_v63 = vpop.f32.mrb[1].mxu0  ;;  %v2590_v10 = vadd.f32 %v428_v62, %v271_v6 }
 0x3ee   :  { %v432_v0 = vpop.f32.mrb[2].mxu0  ;;  %v2592_v11 = vadd.f32 %v430_v63, %v275_v7 }
 0x3ef   :  { %v433_v2 = vpop.f32.mrb[3].mxu0  ;;  %v477_v14 = vsel %vm476_vm6, %v2590_v10, 0.0 }
 0x3f0   :  { %v478_v15 = vsel %vm476_vm6, %v2592_v11, 0.0 }
 0x3f1   :  { %v479_v19 = vadd.f32 %v478_v15, %v477_v14  ;;  %v2153_v14 = vld [vmem:[#allocation5 + $0x390] ss:$24 sps:$4 sm:$0xff]   ;;  %v2158_v15 = vld [vmem:[#allocation5 + $0x214] ss:$24 sps:$4 sm:$0xff]  }
 0x400   :  { %v469_v16 = vpop.f32.mrb[4].mxu0 }
 0x401   :  { %v2600_v17 = vadd.f32 %v469_v16, %v279_v12  ;;  %v471_v18 = vpop.f32.mrb[5].mxu0  ;;  %v2155_v12 = vld [vmem:[#allocation5 + $0x394] ss:$24 sps:$4 sm:$0xff]   ;;  %v2161_v16 = vld [vmem:[#allocation5 + $0x3c4] ss:$24 sps:$4 sm:$0xff]  }
 0x402   :  { %v2602_v20 = vadd.f32 %v471_v18, %v283_v13  ;;  %v473_v21 = vpop.f32.mrb[6].mxu0  ;;  %v2150_v13 = vld [vmem:[#allocation5 + $0x1e0] ss:$24 sps:$4 sm:$0xff]   ;;  %1555 = vmatprep.subr.bf16.mxu0 %v2155_v12 }
 0x403   :  { %v480_v22 = vsel %vm476_vm6, %v2600_v17, 0.0  ;;  %v474_v23 = vpop.f32.mrb[7].mxu0  ;;  %1556 = vmatpush1.bf16.msra.mxu0 %v2153_v14  ;;  %v2159_v18 = vld [vmem:[#allocation5 + $0x3c0] ss:$24 sps:$4 sm:$0xff]  }
 0x404   :  { %v481_v24 = vadd.f32 %v480_v22, %v479_v19  ;;  %v483_v25 = vsel %vm482_vm7, %v2602_v20, 0.0  ;;  %1557 = vmatprep.subr.bf16.mxu0 %v2161_v16  ;;  %v2164_v19 = vld [vmem:[#allocation5 + $0x244] ss:$24 sps:$4 sm:$0xff]   ;;  %v2162_v21 = vld [vmem:[#allocation5 + $0x240] ss:$24 sps:$4 sm:$0xff]  }
 0x405   :  { %v2165_v22 = vld [vmem:[#allocation5 + $0x3f0] ss:$24 sps:$4 sm:$0xff]   ;;  %v2170_v23 = vld [vmem:[#allocation5 + $0x274] ss:$24 sps:$4 sm:$0xff]  }
 0x406   :  { %v484_v26 = vadd.f32 %v483_v25, %v481_v24  ;;  %v2173_v24 = vld [vmem:[#allocation5 + $0x424] ss:$24 sps:$4 sm:$0xff]   ;;  %v2168_v25 = vld [vmem:[#allocation5 + $0x270] ss:$24 sps:$4 sm:$0xff]  }
 0x407   :  { %1558 = vmatpush1.bf16.msra.mxu0 %v2159_v18  ;;  %v2193_v16 = vld [vmem:[#allocation5 + $0x3c] ss:$24 sps:$4 sm:$0xff]   ;;  %v2191_v18 = vld [vmem:[#allocation5 + $0x38] ss:$24 sps:$4 sm:$0xff]  }
 0x408   :  { %485 = vadd.xlane.f32.xlu1 %v484_v26  ;;  %v2171_v26 = vld [vmem:[#allocation5 + $0x420] ss:$24 sps:$4 sm:$0xff]  }
 0x495   :  { %v486_v53 = vpop.xlane.xlu1 %485 }
 0x496   :  { %v488_v54 = vmul.f32 0.0025510204, %v486_v53 }
 0x498   :  { %v2609_v55 = vsub.f32 %v2590_v10, %v488_v54  ;;  %v2612_v56 = vsub.f32 %v2592_v11, %v488_v54  ;;  %v2615_v57 = vsub.f32 %v2600_v17, %v488_v54  ;;  %v2618_v58 = vsub.f32 %v2602_v20, %v488_v54  ;;  %v2152_v11 = vld [vmem:[#allocation5 + $0x1e4] ss:$24 sps:$4 sm:$0xff]   ;;  %v2156_v17 = vld [vmem:[#allocation5 + $0x210] ss:$24 sps:$4 sm:$0xff]   ;;  %v2167_v20 = vld [vmem:[#allocation5 + $0x3f4] ss:$24 sps:$4 sm:$0xff]  }
 0x499   :  { %1528 = vmatprep.subr.bf16.mxu1 %v2152_v11  ;;  %1559 = vmatprep.subr.bf16.mxu0 %v2167_v20  ;;  %v2199_v20 = vld [vmem:[#allocation5 + $0x6c] ss:$24 sps:$4 sm:$0xff]  }
 0x49a   :  { %v493_v59 = vmul.f32 %v2609_v55, %v2609_v55  ;;  %v494_v60 = vmul.f32 %v2612_v56, %v2612_v56  ;;  %v495_v61 = vmul.f32 %v2615_v57, %v2615_v57  ;;  %v496_v62 = vmul.f32 %v2618_v58, %v2618_v58  ;;  %1529 = vmatpush1.bf16.msra.mxu1 %v2150_v13 }
 0x49b   :  { %1530 = vmatprep.subr.bf16.mxu1 %v2158_v15  ;;  %1560 = vmatpush1.bf16.msra.mxu0 %v2165_v22  ;;  %v2188_v15 = vld [vmem:[#allocation5 + $0x10] ss:$24 sps:$4 sm:$0xff]  }
 0x49c   :  { %v497_v63 = vsel %vm476_vm6, %v493_v59, 0.0  ;;  %v498_v0 = vsel %vm476_vm6, %v494_v60, 0.0  ;;  %v500_v5 = vsel %vm476_vm6, %v495_v61, 0.0  ;;  %v502_v7 = vsel %vm482_vm7, %v496_v62, 0.0  ;;  %1561 = vmatprep.subr.bf16.mxu0 %v2173_v24  ;;  %v2197_v22 = vld [vmem:[#allocation5 + $0x68] ss:$24 sps:$4 sm:$0xff]  }
 0x49d   :  { %v499_v2 = vadd.f32 %v498_v0, %v497_v63  ;;  %v2205_v24 = vld [vmem:[#allocation5 + $0x9c] ss:$24 sps:$4 sm:$0xff]  }
 0x49e   :  { %1531 = vmatpush1.bf16.msra.mxu1 %v2156_v17  ;;  %v2196_v17 = vld [vmem:[#allocation5 + $0x44] ss:$24 sps:$4 sm:$0xff]  }
 0x49f   :  { %v501_v6 = vadd.f32 %v500_v5, %v499_v2  ;;  %1532 = vmatprep.subr.bf16.mxu1 %v2164_v19  ;;  %1562 = vmatpush1.bf16.msra.mxu0 %v2171_v26  ;;  %v2194_v19 = vld [vmem:[#allocation5 + $0x40] ss:$24 sps:$4 sm:$0xff]  }
 0x4a0   :  { %1563 = vmatprep.subr.bf16.mxu0 %v2179_v28  ;;  %v2203_v26 = vld [vmem:[#allocation5 + $0x98] ss:$24 sps:$4 sm:$0xff]   ;;  %v2211_v28 = vld [vmem:[#allocation5 + $0xcc] ss:$24 sps:$4 sm:$0xff]  }
 0x4a1   :  { %v503_v10 = vadd.f32 %v502_v7, %v501_v6 }
 0x4a2   :  { %1533 = vmatpush1.bf16.msra.mxu1 %v2162_v21  ;;  %v2202_v21 = vld [vmem:[#allocation5 + $0x74] ss:$24 sps:$4 sm:$0xff]  }
 0x4a3   :  { %504 = vadd.xlane.f32.xlu1 %v503_v10  ;;  %1534 = vmatprep.subr.bf16.mxu1 %v2170_v23  ;;  %v2200_v23 = vld [vmem:[#allocation5 + $0x70] ss:$24 sps:$4 sm:$0xff]  }
 0x4a4   :  { %1564 = vmatpush1.bf16.msra.mxu0 %v2177_v31  ;;  %v2212_v31 = vld [vmem:[#allocation5 + $0xd0] ss:$24 sps:$4 sm:$0xff]  }
 0x4a5   :  { %2021 = vmatprep.subr.msk.bf16.mxu0 %vm171_vm2, %v2016_v33  ;;  %v2220_v33 = vld [vmem:[#allocation5 + $0x104] ss:$24 sps:$4 sm:$0xff]  }
 0x4a6   :  { %1535 = vmatpush1.bf16.msra.mxu1 %v2168_v25  ;;  %v2208_v25 = vld [vmem:[#allocation5 + $0xa4] ss:$24 sps:$4 sm:$0xff]  }
 0x4a7   :  { %1536 = vmatprep.subr.bf16.mxu1 %v2176_v27  ;;  %v2206_v27 = vld [vmem:[#allocation5 + $0xa0] ss:$24 sps:$4 sm:$0xff]  }
 0x4a8   :  { %1566 = vmatpush1.bf16.msra.mxu0 %v1491_v36  ;;  %v2223_v36 = vld [vmem:[#allocation5 + $0x12c] ss:$24 sps:$4 sm:$0xff]  }
 0x4a9   :  { %1672 = vmatprep.subr.bf16.mxu0 %v2190_v38  ;;  %v2221_v38 = vld [vmem:[#allocation5 + $0x128] ss:$24 sps:$4 sm:$0xff]  }
 0x4aa   :  { %1537 = vmatpush1.bf16.msra.mxu1 %v2174_v30  ;;  %v2209_v30 = vld [vmem:[#allocation5 + $0xc8] ss:$24 sps:$4 sm:$0xff]  }
 0x4ab   :  { %1538 = vmatprep.subr.bf16.mxu1 %v2182_v32  ;;  %v2217_v32 = vld [vmem:[#allocation5 + $0xfc] ss:$24 sps:$4 sm:$0xff]  }
 0x4ae   :  { %1539 = vmatpush1.bf16.msra.mxu1 %v2180_v35  ;;  %v2218_v35 = vld [vmem:[#allocation5 + $0x100] ss:$24 sps:$4 sm:$0xff]  }
 0x4af   :  { %1590 = vmatprep.subr.bf16.mxu1 %v2187_v37  ;;  %v2226_v37 = vld [vmem:[#allocation5 + $0x134] ss:$24 sps:$4 sm:$0xff]  }
 0x530   :  { %v505_v39 = vpop.xlane.xlu1 %504 }
 0x531   :  { %v506_v40 = vmul.f32 0.0025510204, %v505_v39  ;;  %v2224_v39 = vld [vmem:[#allocation5 + $0x130] ss:$24 sps:$4 sm:$0xff]  }
 0x533   :  { %v507_v41 = vadd.f32 1e-05, %v506_v40  ;;  %v2229_v40 = vld [vmem:[#allocation5 + $0x15c] ss:$24 sps:$4 sm:$0xff]  }
 0x535   :  { %2335 = vrsqrt.f32 %v507_v41  ;;  %v2232_v41 = vld [vmem:[#allocation5 + $0x164] ss:$24 sps:$4 sm:$0xff]  }
 0x53f   :  { %v2336_v48 = vpop.eup %2335 }
 0x540   :  { %v510_v53 = vmul.f32 %v2336_v48, %v2612_v56  ;;  %v512_v54 = vmul.f32 %v2336_v48, %v2618_v58  ;;  %v509_v59 = vmul.f32 %v2336_v48, %v2609_v55  ;;  %v511_v60 = vmul.f32 %v2336_v48, %v2615_v57  ;;  %v2185_v58 = vld [vmem:[#allocation5 + $0x8] ss:$24 sps:$4 sm:$0xff]   ;;  %v2241_v48 = vld [vmem:[#allocation5 + $0x1bc] ss:$24 sps:$4 sm:$0xff]  }
 0x542   :  { %v536_v61 = vmul.f32 %v522_v44, %v510_v53  ;;  %v538_v62 = vmul.f32 %v530_v45, %v512_v54  ;;  %v535_v63 = vmul.f32 %v518_v46, %v509_v59  ;;  %v537_v0 = vmul.f32 %v526_v47, %v511_v60  ;;  %v2235_v44 = vld [vmem:[#allocation5 + $0x18c] ss:$24 sps:$4 sm:$0xff]   ;;  %v2233_v46 = vld [vmem:[#allocation5 + $0x188] ss:$24 sps:$4 sm:$0xff]   ;;  %v2253_v60 = vld [vmem:[#allocation5 + $0x21c] ss:$24 sps:$4 sm:$0xff]  }
 0x543   :  { %v2238_v45 = vld [vmem:[#allocation5 + $0x194] ss:$24 sps:$4 sm:$0xff]   ;;  %v2236_v47 = vld [vmem:[#allocation5 + $0x190] ss:$24 sps:$4 sm:$0xff]  }
 0x544   :  { %v562_v2 = vadd.f32 %v548_v49, %v536_v61  ;;  %v564_v5 = vadd.f32 %v556_v50, %v538_v62  ;;  %v561_v6 = vadd.f32 %v544_v51, %v535_v63  ;;  %v563_v7 = vadd.f32 %v552_v52, %v537_v0  ;;  %v2244_v49 = vld [vmem:[#allocation5 + $0x1c4] ss:$24 sps:$4 sm:$0xff]   ;;  %v2239_v50 = vld [vmem:[#allocation5 + $0x1b8] ss:$24 sps:$4 sm:$0xff]   ;;  %v2250_v53 = vld [vmem:[#allocation5 + $0x1f4] ss:$24 sps:$4 sm:$0xff]  }
 0x545   :  { %v2242_v51 = vld [vmem:[#allocation5 + $0x1c0] ss:$24 sps:$4 sm:$0xff]   ;;  %v2247_v52 = vld [vmem:[#allocation5 + $0x1ec] ss:$24 sps:$4 sm:$0xff]   ;;  %v2248_v59 = vld [vmem:[#allocation5 + $0x1f0] ss:$24 sps:$4 sm:$0xff]  }
 0x546   :  { %v566_v10 = vmax.f32 %v562_v2, 0.0  ;;  %v568_v11 = vmax.f32 %v564_v5, 0.0  ;;  %v565_v12 = vmax.f32 %v561_v6, 0.0  ;;  %v567_v13 = vmax.f32 %v563_v7, 0.0  ;;  %v2245_v54 = vld [vmem:[#allocation5 + $0x1e8] ss:$24 sps:$4 sm:$0xff]  }
 0x547   :  { %v2256_v61 = vld [vmem:[#allocation5 + $0x224] ss:$24 sps:$4 sm:$0xff]   ;;  %v2251_v62 = vld [vmem:[#allocation5 + $0x218] ss:$24 sps:$4 sm:$0xff]   ;;  %v2262_v2 = vld [vmem:[#allocation5 + $0x254] ss:$24 sps:$4 sm:$0xff]  }
 0x548   :  { %v717_v14 = vpack.c.bf16 %v566_v10, %v566_v10  ;;  %v2652_v56 = vpack.c.bf16 %v568_v11, %v568_v11  ;;  %v2654_v55 = vpack.c.bf16 %v565_v12, %v565_v12  ;;  %v2656_v57 = vpack.c.bf16 %v567_v13, %v567_v13  ;;  %v2254_v63 = vld [vmem:[#allocation5 + $0x220] ss:$24 sps:$4 sm:$0xff]   ;;  %v2259_v0 = vld [vmem:[#allocation5 + $0x24c] ss:$24 sps:$4 sm:$0xff]   ;;  %v2260_v6 = vld [vmem:[#allocation5 + $0x250] ss:$24 sps:$4 sm:$0xff]  }
 0x549   :  { %v2257_v5 = vld [vmem:[#allocation5 + $0x248] ss:$24 sps:$4 sm:$0xff]   ;;  %v2265_v7 = vld [vmem:[#allocation5 + $0x27c] ss:$24 sps:$4 sm:$0xff]   ;;  %v2263_v11 = vld [vmem:[#allocation5 + $0x278] ss:$24 sps:$4 sm:$0xff]  }
 0x54a   :  { %1540 = vmatprep.mubr.bf16.mxu1 %v717_v14  ;;  %2022 = vmatprep.mubr.msk.bf16.mxu0 %vm167_vm3, %v2652_v56  ;;  %v2268_v10 = vld [vmem:[#allocation5 + $0x284] ss:$24 sps:$4 sm:$0xff]   ;;  %v2266_v12 = vld [vmem:[#allocation5 + $0x280] ss:$24 sps:$4 sm:$0xff]  }
 0x54b   :  { %1541 = vmatmul.mubr.bf16.vlgmr.msra.gmra.mrb[8].mxu1 %v2654_v55  ;;  %1582 = vmatmul.mubr.bf16.vlgmr.msra.gmra.mrb[8].mxu0 %v2656_v57  ;;  %v2271_v13 = vld [vmem:[#allocation5 + $0x2ac] ss:$24 sps:$4 sm:$0xff]  }
 0x54c   :  { %1591 = vmatpush1.bf16.msra.mxu1 %v2185_v58  ;;  %1673 = vmatpush1.bf16.msra.mxu0 %v2188_v15  ;;  %v2269_v58 = vld [vmem:[#allocation5 + $0x2a8] ss:$24 sps:$4 sm:$0xff]  }
 0x54d   :  { %1622 = vmatprep.mubr.bf16.mxu1 %v717_v14  ;;  %1704 = vmatprep.mubr.bf16.mxu0 %v717_v14  ;;  %v2274_v14 = vld [vmem:[#allocation5 + $0x2b4] ss:$24 sps:$4 sm:$0xff]   ;;  %v2272_v15 = vld [vmem:[#allocation5 + $0x2b0] ss:$24 sps:$4 sm:$0xff]  }
 0x54e   :  { %1592 = vmatprep.subr.bf16.mxu1 %v2193_v16  ;;  %1674 = vmatprep.subr.bf16.mxu0 %v2196_v17  ;;  %v2277_v16 = vld [vmem:[#allocation5 + $0x2dc] ss:$24 sps:$4 sm:$0xff]  }
 0x54f   :  { %v2280_v17 = vld [vmem:[#allocation5 + $0x2e4] ss:$24 sps:$4 sm:$0xff]  }
 0x550   :  { %1593 = vmatpush1.bf16.msra.mxu1 %v2191_v18  ;;  %1675 = vmatpush1.bf16.msra.mxu0 %v2194_v19  ;;  %v2275_v18 = vld [vmem:[#allocation5 + $0x2d8] ss:$24 sps:$4 sm:$0xff]  }
 0x551   :  { %1594 = vmatprep.subr.bf16.mxu1 %v2199_v20  ;;  %1676 = vmatprep.subr.bf16.mxu0 %v2202_v21  ;;  %v2278_v19 = vld [vmem:[#allocation5 + $0x2e0] ss:$24 sps:$4 sm:$0xff]   ;;  %v2283_v20 = vld [vmem:[#allocation5 + $0x30c] ss:$24 sps:$4 sm:$0xff]  }
 0x552   :  { %v2286_v21 = vld [vmem:[#allocation5 + $0x314] ss:$24 sps:$4 sm:$0xff]  }
 0x554   :  { %1595 = vmatpush1.bf16.msra.mxu1 %v2197_v22  ;;  %1677 = vmatpush1.bf16.msra.mxu0 %v2200_v23  ;;  %v2281_v22 = vld [vmem:[#allocation5 + $0x308] ss:$24 sps:$4 sm:$0xff]  }
 0x555   :  { %1596 = vmatprep.subr.bf16.mxu1 %v2205_v24  ;;  %1678 = vmatprep.subr.bf16.mxu0 %v2208_v25  ;;  %v2284_v23 = vld [vmem:[#allocation5 + $0x310] ss:$24 sps:$4 sm:$0xff]   ;;  %v2289_v24 = vld [vmem:[#allocation5 + $0x33c] ss:$24 sps:$4 sm:$0xff]  }
 0x556   :  { %v2292_v25 = vld [vmem:[#allocation5 + $0x344] ss:$24 sps:$4 sm:$0xff]  }
 0x558   :  { %1597 = vmatpush1.bf16.msra.mxu1 %v2203_v26  ;;  %1679 = vmatpush1.bf16.msra.mxu0 %v2206_v27  ;;  %v2287_v26 = vld [vmem:[#allocation5 + $0x338] ss:$24 sps:$4 sm:$0xff]  }
 0x559   :  { %1598 = vmatprep.subr.bf16.mxu1 %v2211_v28  ;;  %1680 = vmatprep.subr.bf16.mxu0 %v2214_v29  ;;  %v2290_v27 = vld [vmem:[#allocation5 + $0x340] ss:$24 sps:$4 sm:$0xff]   ;;  %v2295_v28 = vld [vmem:[#allocation5 + $0x36c] ss:$24 sps:$4 sm:$0xff]  }
 0x55a   :  { %v2298_v29 = vld [vmem:[#allocation5 + $0x374] ss:$24 sps:$4 sm:$0xff]  }
 0x55c   :  { %1599 = vmatpush1.bf16.msra.mxu1 %v2209_v30  ;;  %1681 = vmatpush1.bf16.msra.mxu0 %v2212_v31  ;;  %v2293_v30 = vld [vmem:[#allocation5 + $0x368] ss:$24 sps:$4 sm:$0xff]  }
 0x55d   :  { %1600 = vmatprep.subr.bf16.mxu1 %v2217_v32  ;;  %1682 = vmatprep.subr.bf16.mxu0 %v2220_v33  ;;  %v2296_v31 = vld [vmem:[#allocation5 + $0x370] ss:$24 sps:$4 sm:$0xff]   ;;  %v2304_v32 = vld [vmem:[#allocation5 + $0x3a4] ss:$24 sps:$4 sm:$0xff]  }
 0x55e   :  { %v2299_v33 = vld [vmem:[#allocation5 + $0x398] ss:$24 sps:$4 sm:$0xff]  }
 0x560   :  { %1601 = vmatpush1.bf16.msra.mxu1 %v2215_v34  ;;  %1683 = vmatpush1.bf16.msra.mxu0 %v2218_v35  ;;  %v2302_v34 = vld [vmem:[#allocation5 + $0x3a0] ss:$24 sps:$4 sm:$0xff]   ;;  %v2307_v35 = vld [vmem:[#allocation5 + $0x3cc] ss:$24 sps:$4 sm:$0xff]  }
 0x561   :  { %1602 = vmatprep.subr.bf16.mxu1 %v2223_v36  ;;  %1684 = vmatprep.subr.bf16.mxu0 %v2226_v37  ;;  %v2305_v36 = vld [vmem:[#allocation5 + $0x3c8] ss:$24 sps:$4 sm:$0xff]  }
 0x562   :  { %v2308_v37 = vld [vmem:[#allocation5 + $0x3d0] ss:$24 sps:$4 sm:$0xff]  }
 0x564   :  { %1603 = vmatpush1.bf16.msra.mxu1 %v2221_v38  ;;  %1685 = vmatpush1.bf16.msra.mxu0 %v2224_v39  ;;  %v2313_v38 = vld [vmem:[#allocation5 + $0x3fc] ss:$24 sps:$4 sm:$0xff]  }
 0x565   :  { %1604 = vmatprep.subr.bf16.mxu1 %v2229_v40  ;;  %1686 = vmatprep.subr.bf16.mxu0 %v2232_v41  ;;  %v2316_v39 = vld [vmem:[#allocation5 + $0x404] ss:$24 sps:$4 sm:$0xff]   ;;  %v2311_v40 = vld [vmem:[#allocation5 + $0x3f8] ss:$24 sps:$4 sm:$0xff]  }
 0x566   :  { %v2314_v41 = vld [vmem:[#allocation5 + $0x400] ss:$24 sps:$4 sm:$0xff]  }
 0x568   :  { %1605 = vmatpush1.bf16.msra.mxu1 %v2227_v42  ;;  %1687 = vmatpush1.bf16.msra.mxu0 %v2230_v43  ;;  %v2319_v42 = vld [vmem:[#allocation5 + $0x42c] ss:$24 sps:$4 sm:$0xff]  }
 0x569   :  { %1606 = vmatprep.subr.bf16.mxu1 %v2235_v44  ;;  %1688 = vmatprep.subr.bf16.mxu0 %v2238_v45  ;;  %v2322_v43 = vld [vmem:[#allocation5 + $0x434] ss:$24 sps:$4 sm:$0xff]   ;;  %v2317_v44 = vld [vmem:[#allocation5 + $0x428] ss:$24 sps:$4 sm:$0xff]  }
 0x56a   :  { %v2320_v45 = vld [vmem:[#allocation5 + $0x430] ss:$24 sps:$4 sm:$0xff]  }
 0x56c   :  { %1607 = vmatpush1.bf16.msra.mxu1 %v2233_v46  ;;  %1689 = vmatpush1.bf16.msra.mxu0 %v2236_v47  ;;  %v2325_v46 = vld [vmem:[#allocation5 + $0x45c] ss:$24 sps:$4 sm:$0xff]  }
 0x56d   :  { %1608 = vmatprep.subr.bf16.mxu1 %v2241_v48  ;;  %1690 = vmatprep.subr.bf16.mxu0 %v2244_v49  ;;  %v2328_v47 = vld [vmem:[#allocation5 + $0x464] ss:$24 sps:$4 sm:$0xff]   ;;  %v714_v48 = vld [vmem:[#allocation5 + $0x488] sm:$0xff]  ;;  %v715_v49 = vld [vmem:[#allocation5 + $0x490] sm:$0xff] }
 0x570   :  { %1609 = vmatpush1.bf16.msra.mxu1 %v2239_v50  ;;  %1691 = vmatpush1.bf16.msra.mxu0 %v2242_v51  ;;  %v2323_v50 = vld [vmem:[#allocation5 + $0x458] ss:$24 sps:$4 sm:$0xff]  }
 0x571   :  { %1610 = vmatprep.subr.bf16.mxu1 %v2247_v52  ;;  %1692 = vmatprep.subr.bf16.mxu0 %v2250_v53  ;;  %v2326_v51 = vld [vmem:[#allocation5 + $0x460] ss:$24 sps:$4 sm:$0xff]   ;;  %v2018_v52 = vcombine.high %v714_v48, %v714_v48  ;;  %v2017_v53 = vcombine.low %v714_v48, %v714_v48 }
 0x574   :  { %1611 = vmatpush1.bf16.msra.mxu1 %v2245_v54  ;;  %1693 = vmatpush1.bf16.msra.mxu0 %v2248_v59  ;;  %v2020_v54 = vcombine.high %v715_v49, %v715_v49  ;;  %v2019_v59 = vcombine.low %v715_v49, %v715_v49  ;;  %v2443_v49 = vmov 1983009808  }
 0x575   :  { %1612 = vmatprep.subr.bf16.mxu1 %v2253_v60  ;;  %1694 = vmatprep.subr.bf16.mxu0 %v2256_v61  ;;  %v1497_v60 = vsel %vm171_vm2, %v2017_v53, 0 }
 0x576   :  { %v1503_v61 = vsel %vm171_vm2, %v2019_v59, 0 }
 0x578   :  { %1613 = vmatpush1.bf16.msra.mxu1 %v2251_v62  ;;  %1695 = vmatpush1.bf16.msra.mxu0 %v2254_v63  ;;  %v720_v62 = vld [vmem:[%s2708_s12] sm:$0x3f]  ;;  %s2444_s12 = smov [#allocation7]  }
 0x579   :  { %1614 = vmatprep.subr.bf16.mxu1 %v2259_v0  ;;  %1696 = vmatprep.subr.bf16.mxu0 %v2262_v2  ;;  %v725_v63 = vrot.slane %v720_v62, %v2574_v3  ;;  %v729_v0 = vrot.slane %v720_v62, %v2577_v4  ;;  %s1831_s15 = sshll.u32 %s2444_s12, 4  ;;  %s1832_s15 = int_to_ptr.vmem [resolvable:$true] %s1831_s15 }
 0x57a   :  { %s2405_s7 = scalar_lea.vmem %s1832_s15, 192  ;;  %p2410_p3 = scmp.lt.s32.totalorder %s1832_s15, %s1832_s15 }
 0x57b   :  { %p2406_p2 = scmp.ne.s32.totalorder %s1832_s15, %s2405_s7  ;;  %p2411_p4 = scmp.lt.s32.totalorder %s2405_s7, %s2405_s7 }
 0x57c   :  { %1615 = vmatpush1.bf16.msra.mxu1 %v2257_v5  ;;  %1697 = vmatpush1.bf16.msra.mxu0 %v2260_v6 }
 0x57d   :  { %1616 = vmatprep.subr.bf16.mxu1 %v2265_v7  ;;  %1698 = vmatprep.subr.bf16.mxu0 %v2268_v10  ;;  %p2412_p5 = por %p2411_p4, %p2410_p3 }
 0x57f   :  { %p2413_p6 = pnand %p2412_p5, %p2406_p2 }
 0x580   :  { %1617 = vmatpush1.bf16.msra.mxu1 %v2263_v11  ;;  %1699 = vmatpush1.bf16.msra.mxu0 %v2266_v12 }
 0x581   :  { %1618 = vmatprep.subr.bf16.mxu1 %v2271_v13  ;;  %1700 = vmatprep.subr.bf16.mxu0 %v2274_v14 }
 0x584   :  { %1619 = vmatpush1.bf16.msra.mxu1 %v2269_v58  ;;  %1701 = vmatpush1.bf16.msra.mxu0 %v2272_v15 }
 0x585   :  { %1620 = vmatprep.subr.bf16.mxu1 %v2277_v16  ;;  %1702 = vmatprep.subr.bf16.mxu0 %v2280_v17 }
 0x588   :  { %1621 = vmatpush1.bf16.msra.mxu1 %v2275_v18  ;;  %1703 = vmatpush1.bf16.msra.mxu0 %v2278_v19 }
 0x589   :  { %1631 = vmatprep.subr.bf16.mxu1 %v2283_v20  ;;  %1713 = vmatprep.subr.bf16.mxu0 %v2286_v21 }
 0x58b   :  { %1623 = vmatmul.mubr.bf16.vlgmr.msra.gmra.mrb[12].mxu1 %v2654_v55  ;;  %1705 = vmatmul.mubr.bf16.vlgmr.msra.gmra.mrb[12].mxu0 %v2654_v55  ;;  %v2301_v55 = vld [vmem:[#allocation5 + $0x39c] ss:$24 sps:$4 sm:$0xff]  }
 0x58c   :  { %1632 = vmatpush1.bf16.msra.mxu1 %v2281_v22  ;;  %2024 = vmatprep.mubr.msk.bf16.mxu1 %vm167_vm3, %v2652_v56 }
 0x58d   :  { %1714 = vmatpush1.bf16.msra.mxu0 %v2284_v23  ;;  %2026 = vmatprep.mubr.msk.bf16.mxu0 %vm167_vm3, %v2652_v56  ;;  %v2310_v56 = vld [vmem:[#allocation5 + $0x3d4] ss:$24 sps:$4 sm:$0xff]   ;;  %v740_v23 = vsub.s32 4, %v2571_v1 }
 0x58e   :  { %1633 = vmatprep.subr.bf16.mxu1 %v2289_v24  ;;  %1715 = vmatprep.subr.bf16.mxu0 %v2292_v25  ;;  %v744_v24 = vsub.s32 5, %v2571_v1  ;;  %v733_v25 = vrot.slane %v720_v62, %v2585_v8 }
 0x590   :  { %1634 = vmatpush1.bf16.msra.mxu1 %v2287_v26  ;;  %v741_v26 = vrot.slane %v720_v62, %v740_v23 }
 0x591   :  { %1716 = vmatpush1.bf16.msra.mxu0 %v2290_v27  ;;  %1635 = vmatprep.subr.bf16.mxu1 %v2295_v28  ;;  %v737_v27 = vrot.slane %v720_v62, %v2588_v9  ;;  %v745_v28 = vrot.slane %v720_v62, %v744_v24 }
 0x592   :  { %1717 = vmatprep.subr.bf16.mxu0 %v2298_v29 }
 0x594   :  { %1636 = vmatpush1.bf16.msra.mxu1 %v2293_v30 }
 0x595   :  { %1718 = vmatpush1.bf16.msra.mxu0 %v2296_v31  ;;  %1637 = vmatprep.subr.bf16.mxu1 %v2301_v55 }
 0x596   :  { %1719 = vmatprep.subr.bf16.mxu0 %v2304_v32 }
 0x598   :  { %1638 = vmatpush1.bf16.msra.mxu1 %v2299_v33 }
 0x599   :  { %1720 = vmatpush1.bf16.msra.mxu0 %v2302_v34  ;;  %1639 = vmatprep.subr.bf16.mxu1 %v2307_v35 }
 0x59a   :  { %1721 = vmatprep.subr.bf16.mxu0 %v2310_v56 }
 0x59c   :  { %1640 = vmatpush1.bf16.msra.mxu1 %v2305_v36 }
 0x59d   :  { %1722 = vmatpush1.bf16.msra.mxu0 %v2308_v37  ;;  %1641 = vmatprep.subr.bf16.mxu1 %v2313_v38 }
 0x59e   :  { %1723 = vmatprep.subr.bf16.mxu0 %v2316_v39 }
 0x5a0   :  { %1642 = vmatpush1.bf16.msra.mxu1 %v2311_v40 }
 0x5a1   :  { %1724 = vmatpush1.bf16.msra.mxu0 %v2314_v41  ;;  %1643 = vmatprep.subr.bf16.mxu1 %v2319_v42 }
 0x5a2   :  { %1725 = vmatprep.subr.bf16.mxu0 %v2322_v43 }
 0x5a4   :  { %1644 = vmatpush1.bf16.msra.mxu1 %v2317_v44 }
 0x5a5   :  { %1726 = vmatpush1.bf16.msra.mxu0 %v2320_v45  ;;  %1645 = vmatprep.subr.bf16.mxu1 %v2325_v46 }
 0x5a6   :  { %1727 = vmatprep.subr.bf16.mxu0 %v2328_v47 }
 0x5a8   :  { %1646 = vmatpush1.bf16.msra.mxu1 %v2323_v50  ;;  %v1799_v50 = vunpack.c.l.s4 %v2443_v49 }
 0x5a9   :  { %1728 = vmatpush1.bf16.msra.mxu0 %v2326_v51  ;;  %2023 = vmatprep.subr.msk.bf16.mxu1 %vm171_vm2, %v2018_v52 }
 0x5aa   :  { %2025 = vmatprep.subr.msk.bf16.mxu0 %vm171_vm2, %v2020_v54  ;;  %v1800_v51 = vunpack.c.0.s8 %v1799_v50 }
 0x5ac   :  { %1648 = vmatpush1.bf16.msra.mxu1 %v1497_v60  ;;  %v1803_v54 = vsub.s32 %v1800_v51, %v2571_v1 }
 0x5ad   :  { %1730 = vmatpush1.bf16.msra.mxu0 %v1503_v61 }
 0x5af   :  { %1664 = vmatmul.mubr.bf16.vlgmr.msra.gmra.mrb[12].mxu1 %v2656_v57 }
 0x5b0   :  { %1746 = vmatmul.mubr.bf16.vlgmr.msra.gmra.mrb[12].mxu0 %v2656_v57 }
 0x61e   :  { %v1542_v2 = vpop.f32.mrb[8].mxu1  ;;  %v1583_v5 = vpop.f32.mrb[8].mxu0 }
 0x61f   :  { %v1543_v6 = vadd.f32 %v1542_v2, %v725_v63  ;;  %v1544_v7 = vpop.f32.mrb[9].mxu1  ;;  %v1585_v10 = vpop.f32.mrb[9].mxu0 }
 0x620   :  { %v1545_v11 = vadd.f32 %v1544_v7, %v729_v0  ;;  %v1546_v12 = vpop.f32.mrb[10].mxu1  ;;  %v1587_v13 = vpop.f32.mrb[10].mxu0 }
 0x621   :  { %v1584_v14 = vadd.f32 %v1583_v5, %v1543_v6  ;;  %v1547_v58 = vpop.f32.mrb[11].mxu1  ;;  %v1588_v15 = vpop.f32.mrb[11].mxu0 }
 0x622   :  { %v1586_v57 = vadd.f32 %v1585_v10, %v1545_v11 }
 0x623   :  { %v2027_v16 = vmul.f32 -1.442695, %v1584_v14 }
 0x624   :  { %v2028_v17 = vmul.f32 -1.442695, %v1586_v57 }
 0x625   :  { %2337 = vpow2.f32 %v2027_v16 }
 0x626   :  { %2339 = vpow2.f32 %v2028_v17 }
 0x62f   :  { %v2338_v18 = vpop.eup %2337 }
 0x630   :  { %v2340_v3 = vpop.eup %2339  ;;  %v1772_v19 = vadd.f32 1.0, %v2338_v18 }
 0x631   :  { %v1773_v4 = vadd.f32 1.0, %v2340_v3 }
 0x632   :  { %2341 = vrcp.f32 %v1772_v19 }
 0x633   :  { %2343 = vrcp.f32 %v1773_v4 }
 0x63c   :  { %v2342_v20 = vpop.eup %2341 }
 0x63d   :  { %v2344_v21 = vpop.eup %2343 }
 0x63e   :  { %v1796_v22 = vcombine.low %v2342_v20, %v2344_v21 }
 0x640   :  { %v1804_v63 = vrot.slane %v1796_v22, %v1803_v54 }
 0x682   :  { %v1665_v29 = vpop.f32.mrb[12].mxu1 }
 0x683   :  { %v2059_v30 = vadd.f32 %v1665_v29, %v733_v25  ;;  %v1747_v31 = vpop.f32.mrb[12].mxu0  ;;  %v1667_v55 = vpop.f32.mrb[13].mxu1 }
 0x684   :  { %v2061_v32 = vadd.f32 %v1747_v31, %v741_v26  ;;  %v2060_v33 = vadd.f32 %v1667_v55, %v737_v27  ;;  %v1749_v34 = vpop.f32.mrb[13].mxu0  ;;  %v1669_v35 = vpop.f32.mrb[14].mxu1 }
 0x685   :  { %v2029_v56 = vmul.f32 -1.442695, %v2059_v30  ;;  %v2062_v36 = vadd.f32 %v1749_v34, %v745_v28  ;;  %v1751_v37 = vpop.f32.mrb[14].mxu0  ;;  %v1670_v38 = vpop.f32.mrb[15].mxu1 }
 0x686   :  { %v2031_v39 = vmul.f32 -1.442695, %v2061_v32  ;;  %v2030_v40 = vmul.f32 -1.442695, %v2060_v33  ;;  %v1752_v41 = vpop.f32.mrb[15].mxu0 }
 0x687   :  { %2345 = vpow2.f32 %v2029_v56  ;;  %v2032_v8 = vmul.f32 -1.442695, %v2062_v36 }
 0x688   :  { %2347 = vpow2.f32 %v2031_v39 }
 0x689   :  { %2349 = vpow2.f32 %v2030_v40 }
 0x68a   :  { %2351 = vpow2.f32 %v2032_v8 }
 0x691   :  { %v2346_v9 = vpop.eup %2345 }
 0x692   :  { %v2348_v42 = vpop.eup %2347  ;;  %v1774_v43 = vadd.f32 1.0, %v2346_v9 }
 0x693   :  { %v2350_v44 = vpop.eup %2349  ;;  %v1776_v45 = vadd.f32 1.0, %v2348_v42 }
 0x694   :  { %v2352_v46 = vpop.eup %2351  ;;  %2353 = vrcp.f32 %v1774_v43  ;;  %v1775_v47 = vadd.f32 1.0, %v2350_v44 }
 0x695   :  { %2355 = vrcp.f32 %v1776_v45  ;;  %v1777_v48 = vadd.f32 1.0, %v2352_v46 }
 0x696   :  { %2357 = vrcp.f32 %v1775_v47 }
 0x697   :  { %2359 = vrcp.f32 %v1777_v48 }
 0x69e   :  { %v2354_v52 = vpop.eup %2353 }
 0x69f   :  { %v2356_v53 = vpop.eup %2355 }
 0x6a0   :  { %v2358_v59 = vpop.eup %2357 }
 0x6a1   :  { %v2360_v60 = vpop.eup %2359  ;;  %v1797_v61 = vcombine.low %v2354_v52, %v2358_v59 }
 0x6a2   :  { %v1813_v62 = vcombine.low %v2356_v53, %v2360_v60 }
 0x6a3   :  { %v1811_v0 = vrot.slane %v1797_v61, %v1803_v54 }
 0x6a4   :  { %2033 = vst.sshfl [vmem:[#allocation7 + $0x8] sm:$0x33 pattern:$0x76325410] %v1813_v62 }
 0x6a5   :  { %v1812_v2 = vcombine.low %v1804_v63, %v1811_v0 }
 0x6a7   :  { %1823 = vst [vmem:[#allocation7] sm:$0xff] %v1812_v2 }
 0x6a8   :  { %2416 = shalt.err (!%p2413_p6)
}
 0x6a9   :  { %s2417_s17 = scalar_lea.hbm %s2709_s13, 192 }
 0x6aa   :  { %p2418_p7 = scmp.ne.s32.totalorder %s2709_s13, %s2417_s17  ;;  %p2421_p8 = scmp.lt.u32.totalorder %s2417_s17, %s2709_s13 }
 0x6ac   :  { %p2423_p9 = pnand %p2421_p8, %p2418_p7 }
 0x6ae   :  { %2426 = shalt.err (!%p2423_p9)
}
 0x6af   :  { %1834 = dma.vmem_to_hbm [thread:$0]  %s1832_s15, 192, %s2709_s13, [#allocation4]  }
 0x6b0   :  { %2431 = dma.done.wait [#allocation4], 192  }
 0x6b1   :  { %2432 = vsyncadd [#allocation4], 4294967104 }
 0x6b2   :  { %1838 = vsyncpa [#allocation3], 1 }
 0x6b3   :  { %1839 = vsyncpa [#allocation6], 1 }
 0x6b4   :  { %1840 = vsyncpa [#allocation4], 1 }

</bundles_post_ra>
